<compile_context>
chip_gen: v6e
topology: v6e:2x2x1
jax: 0.10.0
libtpu: 0.0.40
codegen_flags: <defaults>
</compile_context>

<pallas_src>
import functools

import jax
import jax.numpy as jnp
from jax import lax
from jax.experimental import pallas as pl
from jax.experimental.pallas import tpu as pltpu

MASK_MIN = -2.3819763e+38


# ---------------------------------------------------------------------------
# helpers
# ---------------------------------------------------------------------------
def _pick_tile(dim, pref):
    """Largest of {pref, pref/2, pref/4} that divides dim, else the full dim."""
    if dim <= pref:
        return dim
    for cand in (pref, pref // 2, pref // 4):
        if dim % cand == 0:
            return cand
    return dim


def _vmem_limit(nbytes):
    # double-buffered block estimate * 2 + headroom, capped below physical
    # VMEM (re-derive the cap for v7x's 64 MiB if tiles are sized up).
    return int(min(100 * 2**20, max(2 * nbytes + (2 << 20), 8 * 2**20)))


# ---------------------------------------------------------------------------
# Tiled matmul kernel (q/k/v fused projection and o_proj)
# ---------------------------------------------------------------------------
def _matmul_kernel(x_ref, w_ref, o_ref, acc_ref):
    k = pl.program_id(2)

    @pl.when(k == 0)
    def _init():
        acc_ref[...] = jnp.zeros_like(acc_ref)

    acc_ref[...] += jnp.dot(x_ref[...], w_ref[...],
                            preferred_element_type=jnp.float32)

    @pl.when(k == pl.num_programs(2) - 1)
    def _store():
        o_ref[...] = acc_ref[...].astype(o_ref.dtype)


def pallas_matmul(x, w, *, tm=256, tn=256, tk=512, out_dtype=None):
    """(M,K)@(K,N) with a real grid and an f32 VMEM accumulator.

    MXU runs in the input dtype (pass bf16 operands for bf16 throughput) with
    f32 accumulation.  Default tile prefs are 256-aligned for v6e/v7x; use
    128-aligned prefs on v5e.
    """
    M, K = x.shape
    K2, N = w.shape
    assert K == K2
    out_dtype = out_dtype or x.dtype
    tm = _pick_tile(M, tm)
    tn = _pick_tile(N, tn)
    tk = _pick_tile(K, tk)
    est = 2 * (tm * tk * x.dtype.itemsize + tk * tn * w.dtype.itemsize
               + tm * tn * jnp.dtype(out_dtype).itemsize) + tm * tn * 4
    return pl.pallas_call(
        _matmul_kernel,
        grid=(M // tm, N // tn, K // tk),
        in_specs=[
            pl.BlockSpec((tm, tk), lambda i, j, k: (i, k)),
            pl.BlockSpec((tk, tn), lambda i, j, k: (k, j)),
        ],
        out_specs=pl.BlockSpec((tm, tn), lambda i, j, k: (i, j)),
        out_shape=jax.ShapeDtypeStruct((M, N), out_dtype),
        scratch_shapes=[pltpu.VMEM((tm, tn), jnp.float32)],
        compiler_params=pltpu.CompilerParams(
            dimension_semantics=("parallel", "parallel", "arbitrary"),
            vmem_limit_bytes=_vmem_limit(est)),
    )(x, w)


# ---------------------------------------------------------------------------
# Attention kernel: RoPE + softcapped, masked softmax attention (GQA aware)
# ---------------------------------------------------------------------------
def _attention_kernel(q_ref, k_ref, v_ref, mask_ref, cosq_ref, sinq_ref,
                      cosk_ref, sink_ref, *rest, scaling_factor, softcap,
                      is_local, window, block_q, return_scores):
    if return_scores:
        out_ref, scores_ref, krot_ref = rest
    else:
        out_ref, krot_ref = rest
        scores_ref = None

    qi = pl.program_id(2)   # query-row tile index
    g = pl.program_id(3)    # query head within the kv group (innermost)

    hd = q_ref.shape[-1]
    hd2 = hd // 2

    def rope(x, cos2, sin2):
        # rope(x) = x*[cos,cos] + rotate_half(x)*[-sin,sin]; the half swap is a
        # lane roll (XLU) instead of concatenating two slices.
        return x * cos2 + pltpu.roll(x, shift=hd2, axis=1) * sin2

    # RoPE(k) once per kv head; k/v blocks stay resident (constant block
    # index) across the whole (q_tile, q_head_in_group) inner sweep.
    @pl.when(jnp.logical_and(qi == 0, g == 0))
    def _rope_k():
        krot_ref[...] = rope(k_ref[...].astype(jnp.float32),
                             cosk_ref[...], sink_ref[...]).astype(krot_ref.dtype)

    q = rope(q_ref[...].astype(jnp.float32),
             cosq_ref[...], sinq_ref[...]).astype(q_ref.dtype)
    k = krot_ref[...]
    v = v_ref[...]

    # scores (block_q, S): q @ k^T with f32 accumulation on the MXU
    s = lax.dot_general(q, k, (((1,), (1,)), ((), ())),
                        preferred_element_type=jnp.float32)
    s = s * scaling_factor
    if softcap is not None:
        s = jnp.tanh(s * (1.0 / softcap)) * softcap

    mask = mask_ref[...].astype(jnp.float32)
    if is_local:
        # sliding-window band generated in-kernel (no extra HBM mask pass)
        q_idx = lax.broadcasted_iota(jnp.int32, s.shape, 0) + qi * block_q
        k_idx = lax.broadcasted_iota(jnp.int32, s.shape, 1)
        diff = q_idx - k_idx
        in_band = jnp.logical_and(diff > -window, diff < window)
        mask = jnp.where(in_band, mask, MASK_MIN)
    s = s + mask

    # softmax in f32 (matches scores.float().softmax(-1).type_as(q));
    # EUP reciprocal instead of a vector divide.
    m = jnp.max(s, axis=-1, keepdims=True)
    e = jnp.exp(s - m)
    denom = jnp.sum(e, axis=-1, keepdims=True)
    p = (e * pl.reciprocal(denom, approx=True)).astype(out_ref.dtype)

    if return_scores:
        scores_ref[...] = p.astype(scores_ref.dtype)

    out_ref[...] = jnp.dot(p.astype(v.dtype), v,
                           preferred_element_type=jnp.float32
                           ).astype(out_ref.dtype)


def pallas_attention(qkv, mask, cos2, sin2, *, num_heads, num_kv_heads,
                     head_dim, scaling_factor, softcap, is_local,
                     sliding_window_size, block_q=None, return_scores=True):
    """qkv: (B, S, (H + 2*KV) * hd) fused projection output.

    Grid = (B, KV, S // block_q, H // KV) with the query-head-in-group axis
    innermost: k/v (and RoPE(k)) are reused across the GQA group and across
    all q tiles; the mask tile is reused across the group.
    """
    B, S, _ = qkv.shape
    H, KV, hd = num_heads, num_kv_heads, head_dim
    qpg = H // KV
    if block_q is None:
        block_q = min(S, 512)
    if S % block_q != 0:
        block_q = S
    sq = block_q
    n_q = S // sq
    dtype = qkv.dtype

    kernel = functools.partial(
        _attention_kernel, scaling_factor=scaling_factor, softcap=softcap,
        is_local=is_local, window=sliding_window_size, block_q=sq,
        return_scores=return_scores)

    in_specs = [
        # q: head (kv*qpg + g), rows [qi*sq, (qi+1)*sq)
        pl.BlockSpec((None, sq, hd), lambda b, kv, qi, g: (b, qi, kv * qpg + g)),
        # k / v: full sequence for kv head `kv`; block index constant over the
        # inner (qi, g) sweep -> DMA'd once per (batch, kv head)
        pl.BlockSpec((None, S, hd), lambda b, kv, qi, g: (b, 0, H + kv)),
        pl.BlockSpec((None, S, hd), lambda b, kv, qi, g: (b, 0, H + KV + kv)),
        # additive mask rows for this q tile (broadcast over heads)
        pl.BlockSpec((None, None, sq, S), lambda b, kv, qi, g: (b, 0, qi, 0)),
        # rotary tables: q-tile rows and full-S (for k)
        pl.BlockSpec((sq, hd), lambda b, kv, qi, g: (qi, 0)),
        pl.BlockSpec((sq, hd), lambda b, kv, qi, g: (qi, 0)),
        pl.BlockSpec((S, hd), lambda b, kv, qi, g: (0, 0)),
        pl.BlockSpec((S, hd), lambda b, kv, qi, g: (0, 0)),
    ]
    out_specs = [
        # lane-dense (B, S, H*hd) context, consumed by o_proj without transpose
        pl.BlockSpec((None, sq, hd), lambda b, kv, qi, g: (b, qi, kv * qpg + g)),
    ]
    out_shape = [jax.ShapeDtypeStruct((B, S, H * hd), dtype)]
    if return_scores:
        out_specs.append(
            pl.BlockSpec((None, None, sq, S),
                         lambda b, kv, qi, g: (b, kv * qpg + g, qi, 0)))
        out_shape.append(jax.ShapeDtypeStruct((B, H, S, S), dtype))

    isz = dtype.itemsize
    est = 2 * (sq * hd * isz + 2 * S * hd * isz
               + sq * S * mask.dtype.itemsize
               + 2 * sq * hd * 4 + 2 * S * hd * 4
               + sq * hd * isz
               + (sq * S * isz if return_scores else 0))
    est += S * hd * isz  # roped-k scratch

    outs = pl.pallas_call(
        kernel,
        grid=(B, KV, n_q, qpg),
        in_specs=in_specs,
        out_specs=out_specs,
        out_shape=out_shape,
        scratch_shapes=[pltpu.VMEM((S, hd), dtype)],
        compiler_params=pltpu.CompilerParams(
            dimension_semantics=("parallel", "parallel",
                                 "arbitrary", "arbitrary"),
            vmem_limit_bytes=_vmem_limit(est)),
    )(qkv, qkv, qkv, mask, cos2, sin2, cos2, sin2)

    if return_scores:
        ctx, scores = outs
    else:
        (ctx,) = outs
        scores = None
    return ctx, scores


# ---------------------------------------------------------------------------
# GemmaAttention (Pallas-backed)
# ---------------------------------------------------------------------------
class GemmaAttentionPallas:
    """Forward of GemmaAttention (train_attn=False path) on Pallas TPU.

    Rotary tables are passed as (cos, sin) of shape (S, head_dim // 2)
    instead of the complex freqs_cis tensor.
    """

    def __init__(self, hidden_size, num_heads, num_kv_heads,
                 attn_logit_softcapping, head_dim, attn_type,
                 sliding_window_size, key, param_dtype=jnp.float32):
        self.hidden_size = hidden_size
        self.num_heads = num_heads
        self.num_kv_heads = num_kv_heads
        self.head_dim = head_dim
        self.scaling_factor = head_dim ** (-0.5)
        self.num_queries_per_group = num_heads // num_kv_heads
        self.attn_type = attn_type
        self.sliding_window_size = sliding_window_size
        self.attn_logit_softcapping = attn_logit_softcapping
        # TODO(synk): train_attn branch (HedgehogFeatureMap / quadratic_attention)
        # not implemented; this module mirrors the default train_attn=False path.

        # Deterministic weight init; nn.Linear weight layout is (out, in).
        k0, k1, k2, k3 = jax.random.split(key, 4)
        s = 0.05
        self.wq = (jax.random.normal(k0, (num_heads * head_dim, hidden_size)) * s
                   ).astype(param_dtype)
        self.wk = (jax.random.normal(k1, (num_kv_heads * head_dim, hidden_size)) * s
                   ).astype(param_dtype)
        self.wv = (jax.random.normal(k2, (num_kv_heads * head_dim, hidden_size)) * s
                   ).astype(param_dtype)
        self.wo = (jax.random.normal(k3, (hidden_size, num_heads * head_dim)) * s
                   ).astype(param_dtype)
        # fused q/k/v projection weight, transposed once: (D, (H + 2*KV) * hd)
        self.w_qkv_t = jnp.concatenate([self.wq, self.wk, self.wv], axis=0).T
        self.wo_t = self.wo.T

    def __call__(self, hidden_states, freqs_cos, freqs_sin, mask, *,
                 return_scores=True, block_q=None):
        B, S, D = hidden_states.shape
        H, KV, hd = self.num_heads, self.num_kv_heads, self.head_dim

        # fused q/k/v projection: one HBM pass over the activations
        x2d = hidden_states.reshape(B * S, D)
        qkv = pallas_matmul(x2d, self.w_qkv_t).reshape(B, S, (H + 2 * KV) * hd)

        # rotary tables folded to (S, hd): [cos, cos] and [-sin, sin]
        cos2 = jnp.concatenate([freqs_cos, freqs_cos], axis=-1)
        sin2 = jnp.concatenate([-freqs_sin, freqs_sin], axis=-1)

        ctx, scores = pallas_attention(
            qkv, mask, cos2, sin2,
            num_heads=H, num_kv_heads=KV, head_dim=hd,
            scaling_factor=self.scaling_factor,
            softcap=self.attn_logit_softcapping,
            is_local=(self.attn_type == 'local'),
            sliding_window_size=self.sliding_window_size,
            block_q=block_q, return_scores=return_scores)

        # o_proj directly on the lane-dense (B*S, H*hd) context (no transpose)
        out = pallas_matmul(ctx.reshape(B * S, H * hd), self.wo_t
                            ).reshape(B, S, self.hidden_size)

        # (B, H, S, hd) view only for the returned aux output
        attn_output = jnp.transpose(ctx.reshape(B, S, H, hd), (0, 2, 1, 3))
        return {'hidden_states': out,
                'attn_scores': scores,
                'attn_output': attn_output}


# ---------------------------------------------------------------------------
# Pure-JAX reference (mirrors the PyTorch forward) for verification
# ---------------------------------------------------------------------------
def _rope_ref(x, cos, sin):
    hd2 = x.shape[-1] // 2
    x1, x2 = x[..., :hd2], x[..., hd2:]
    c = cos[None, :, None, :]
    s = sin[None, :, None, :]
    return jnp.concatenate([x1 * c - x2 * s, x2 * c + x1 * s], axis=-1)


def reference_forward(mod, x, cos, sin, mask):
    P = jax.lax.Precision.HIGHEST
    B, S, D = x.shape
    H, KV, hd = mod.num_heads, mod.num_kv_heads, mod.head_dim
    q = jnp.einsum('bsd,od->bso', x, mod.wq, precision=P).reshape(B, S, H, hd)
    k = jnp.einsum('bsd,od->bso', x, mod.wk, precision=P).reshape(B, S, KV, hd)
    v = jnp.einsum('bsd,od->bso', x, mod.wv, precision=P).reshape(B, S, KV, hd)
    q = _rope_ref(q, cos, sin)
    k = _rope_ref(k, cos, sin)
    if KV != H:
        k = jnp.repeat(k, H // KV, axis=2)
        v = jnp.repeat(v, H // KV, axis=2)
    q = q.transpose(0, 2, 1, 3)
    k = k.transpose(0, 2, 1, 3)
    v = v.transpose(0, 2, 1, 3)
    if mod.attn_type == 'local':
        all_ones = jnp.ones_like(mask)
        sliding = (jnp.triu(all_ones, 1 - mod.sliding_window_size) *
                   jnp.tril(all_ones, mod.sliding_window_size - 1))
        mask = jnp.where(sliding == 1, mask, MASK_MIN)
    s = jnp.einsum('bhqd,bhkd->bhqk', q, k, precision=P) * mod.scaling_factor
    cap = mod.attn_logit_softcapping
    if cap is not None:
        s = jnp.tanh(s / cap) * cap
    s = s + mask
    p = jax.nn.softmax(s.astype(jnp.float32), axis=-1)
    o = jnp.einsum('bhqk,bhkd->bhqd', p, v, precision=P)
    out = o.transpose(0, 2, 1, 3).reshape(B, S, H * hd)
    out = jnp.einsum('bso,do->bsd', out, mod.wo, precision=P)
    return out, p, o


def precompute_rotary(seq_len, head_dim, theta=10000.0):
    inv = 1.0 / (theta ** (jnp.arange(0, head_dim, 2, dtype=jnp.float32) / head_dim))
    t = jnp.arange(seq_len, dtype=jnp.float32)
    freqs = jnp.outer(t, inv)  # (S, head_dim // 2)
    return jnp.cos(freqs), jnp.sin(freqs)


if __name__ == "__main__":
    # small config consistent with GemmaAttention (lane-aligned head_dim)
    B, S = 2, 16
    hidden_size = 32
    num_heads = 4
    num_kv_heads = 2
    head_dim = 128
    attn_type = 'local'
    sliding_window_size = 8
    attn_logit_softcapping = 50.0

    key = jax.random.PRNGKey(0)
    k_x, k_w = jax.random.split(key)

    mod = GemmaAttentionPallas(hidden_size, num_heads, num_kv_heads,
                               attn_logit_softcapping, head_dim, attn_type,
                               sliding_window_size, key=k_w)

    hidden_states = jax.random.normal(k_x, (B, S, hidden_size), jnp.float32)
    cos, sin = precompute_rotary(S, head_dim)

    # causal additive mask (B, 1, S, S): 0 where allowed, large negative otherwise
    causal = jnp.tril(jnp.ones((S, S), jnp.float32))
    mask = jnp.where(causal == 1, 0.0, MASK_MIN)[None, None, :, :]
    mask = jnp.broadcast_to(mask, (B, 1, S, S))

    # block_q=8 exercises the query-tile grid axis (2 q tiles per head)
    out = mod(hidden_states, cos, sin, mask, block_q=8)
    out = jax.block_until_ready(out)

    # verify against pure-JAX reference of the PyTorch forward
    ref_hidden, ref_scores, ref_attn = reference_forward(
        mod, hidden_states, cos, sin, mask)
    assert jnp.allclose(out['hidden_states'], ref_hidden, atol=2e-3, rtol=2e-3), \
        float(jnp.max(jnp.abs(out['hidden_states'] - ref_hidden)))
    assert jnp.allclose(out['attn_scores'], ref_scores, atol=2e-3, rtol=2e-3), \
        float(jnp.max(jnp.abs(out['attn_scores'] - ref_scores)))
    assert jnp.allclose(out['attn_output'], ref_attn, atol=2e-3, rtol=2e-3), \
        float(jnp.max(jnp.abs(out['attn_output'] - ref_attn)))

    print("KERNEL_OK")
</pallas_src>

<mosaic_0001>
module attributes {stable_mosaic.version = 11 : i64} {
  func.func @_matmul_kernel(%arg0: i32, %arg1: i32, %arg2: i32, %arg3: memref<32x32xf32, #tpu.memory_space<vmem>>, %arg4: memref<32x256xf32, #tpu.memory_space<vmem>>, %arg5: memref<32x256xf32, #tpu.memory_space<vmem>>, %arg6: memref<32x256xf32, #tpu.memory_space<vmem>>) attributes {dimension_semantics = [#tpu.dimension_semantics<parallel>, #tpu.dimension_semantics<parallel>, #tpu.dimension_semantics<arbitrary>], iteration_bounds = array<i64: 1, 4, 1>, scalar_prefetch = 0 : i64, scratch_operands = 1 : i64, tpu.core_type = #tpu.core_type<tc>, window_params = [{transform_indices = @transform_0, window_bounds = array<i64: 32, 32>}, {transform_indices = @transform_1, window_bounds = array<i64: 32, 256>}, {transform_indices = @transform_2, window_bounds = array<i64: 32, 256>}]} {
    %c0_i32 = arith.constant 0 : i32
    %0 = arith.cmpi eq, %arg2, %c0_i32 : i32
    %1 = arith.extui %0 : i1 to i32
    %c0_i32_0 = arith.constant 0 : i32
    %2 = arith.cmpi ne, %1, %c0_i32_0 : i32
    scf.if %2 {
      %cst_10 = arith.constant 0.000000e+00 : f32
      %12 = vector.broadcast %cst_10 : f32 to vector<32x256xf32>
      %c0_11 = arith.constant 0 : index
      %c0_12 = arith.constant 0 : index
      %13 = vector.load %arg6[%c0_11, %c0_12] : memref<32x256xf32, #tpu.memory_space<vmem>>, vector<32x256xf32>
      tpu.vector_store %arg6[%c0_11, %c0_12], %12 {strides = array<i32>} : memref<32x256xf32, #tpu.memory_space<vmem>>, vector<32x256xf32>,
    } else {
    }
    %c0 = arith.constant 0 : index
    %c0_1 = arith.constant 0 : index
    %3 = vector.load %arg6[%c0, %c0_1] : memref<32x256xf32, #tpu.memory_space<vmem>>, vector<32x256xf32>
    %c0_2 = arith.constant 0 : index
    %c0_3 = arith.constant 0 : index
    %4 = vector.load %arg3[%c0_2, %c0_3] : memref<32x32xf32, #tpu.memory_space<vmem>>, vector<32x32xf32>
    %c0_4 = arith.constant 0 : index
    %c0_5 = arith.constant 0 : index
    %5 = vector.load %arg4[%c0_4, %c0_5] : memref<32x256xf32, #tpu.memory_space<vmem>>, vector<32x256xf32>
    %cst = arith.constant dense<0.000000e+00> : vector<32x256xf32>
    %6 = tpu.matmul %4, %5, %cst {dimension_numbers = #tpu.dot_dimension_numbers<[1], [0], [0], [1], [0, 0, 1, 1], [], []>} : vector<32x32xf32>, vector<32x256xf32>, vector<32x256xf32> -> vector<32x256xf32>
    %7 = arith.addf %3, %6 : vector<32x256xf32>
    %c0_6 = arith.constant 0 : index
    %c0_7 = arith.constant 0 : index
    %8 = vector.load %arg6[%c0_6, %c0_7] : memref<32x256xf32, #tpu.memory_space<vmem>>, vector<32x256xf32>
    tpu.vector_store %arg6[%c0_6, %c0_7], %7 {strides = array<i32>} : memref<32x256xf32, #tpu.memory_space<vmem>>, vector<32x256xf32>,
    %c0_i32_8 = arith.constant 0 : i32
    %9 = arith.cmpi eq, %arg2, %c0_i32_8 : i32
    %10 = arith.extui %9 : i1 to i32
    %c0_i32_9 = arith.constant 0 : i32
    %11 = arith.cmpi ne, %10, %c0_i32_9 : i32
    scf.if %11 {
      %c0_10 = arith.constant 0 : index
      %c0_11 = arith.constant 0 : index
      %12 = vector.load %arg6[%c0_10, %c0_11] : memref<32x256xf32, #tpu.memory_space<vmem>>, vector<32x256xf32>
      %c0_12 = arith.constant 0 : index
      %c0_13 = arith.constant 0 : index
      %13 = vector.load %arg5[%c0_12, %c0_13] : memref<32x256xf32, #tpu.memory_space<vmem>>, vector<32x256xf32>
      tpu.vector_store %arg5[%c0_12, %c0_13], %12 {strides = array<i32>} : memref<32x256xf32, #tpu.memory_space<vmem>>, vector<32x256xf32>,
    } else {
    }
    return
  }
  func.func @transform_0(%arg0: i32, %arg1: i32, %arg2: i32) -> (i32, i32) {
    %c0_i32 = arith.constant 0 : i32
    return %arg0, %arg2 : i32, i32
  }
  func.func @transform_1(%arg0: i32, %arg1: i32, %arg2: i32) -> (i32, i32) {
    %c0_i32 = arith.constant 0 : i32
    return %arg2, %arg1 : i32, i32
  }
  func.func @transform_2(%arg0: i32, %arg1: i32, %arg2: i32) -> (i32, i32) {
    %c0_i32 = arith.constant 0 : i32
    return %arg0, %arg1 : i32, i32
  }
}

</mosaic_0001>

<bundles_post_ra>
// kernel: tpu_custom_call.1
= control target key start
LH: loop header
LB: loop body
LE: loop exit
PB: predicated region body
PF: predicated region fallthrough
CT: control target
= control target key end

     0   :  { %7 = vsyncpa [#allocation4], 0  ;;  %s968_s0 = inlined_call_operand.hbm [shape: f32[32,32], index: 0, kind: input, shape index: {}]   ;;  %s969_s1 = inlined_call_operand.hbm [shape: f32[32,1024], index: 1, kind: input, shape index: {}]   ;;  %s970_s2 = inlined_call_operand.hbm [shape: f32[32,1024], index: 2, kind: output, shape index: {}]  }
   0x1   :  { %8 = vsyncpa [#allocation7], 0 }
   0x2   :  { %10 = vsyncpa [#allocation7 + $0x1], 0 }
   0x3   :  { %11 = vsyncpa [#allocation5], 0 }
   0x4   :  { %13 = vsyncpa [#allocation5 + $0x1], 0  ;;  %s791_s9 = smov 0   ;;  %s793_s10 = smov 0  }
   0x5   :  { %s795_s11 = smov 0   ;;  %s797_s12 = smov 0  }
   0x6   :  { %s799_s13 = smov 0   ;;  %s801_s14 = smov 0  }
   0x7 LB: > { %s511_s15 = sadd.s32 4294967295, %s762_s14   ;;  %s512_s16 = sadd.s32 4294967294, %s762_s14   ;;  %s762_s14 = sphi %s801_s14, %s19_s14   ;;  %s758_s13 = sphi %s799_s13, %s991_s13   ;;  %s754_s12 = sphi %s797_s12, %s990_s12   ;;  %s750_s11 = sphi %s795_s11, %s989_s11   ;;  %s746_s10 = sphi %s793_s10, %s988_s10   ;;  %s742_s9 = sphi %s791_s9, %s987_s9  }
   0x8   : > { %p82_p0 = scmp.ne.s32.totalorder %s750_s11, %s746_s10  ;;  %p83_p1 = scmp.eq.s32.totalorder %s762_s14, 0 }
   0x9   : > { %p88_p2 = scmp.ne.s32.totalorder %s746_s10, %s742_s9  ;;  %p828_p3 = scmp.eq.s32.totalorder %s511_s15, 0 }
   0xa   : > { %p832_p4 = por %p83_p1, %p82_p0  ;;  %p114_p5 = scmp.eq.s32.totalorder %s511_s15, 3 }
   0xb   : > { %p838_p6 = por %p828_p3, %p88_p2  ;;  %p120_p7 = scmp.eq.s32.totalorder %s512_s16, 3 }
   0xc   : > { %p842_p8 = por %p114_p5, %p82_p0  ;;  %p513_p9 = scmp.ge.s32.totalorder %s762_s14, 1 }
   0xd   : > { %s976_s19 = scalar_select %p838_p6, 1, 0 }
   0xe   : > { %s977_s20 = scalar_select %p842_p8, 1, 0 }
   0xf   : > { %p847_p10 = por %p120_p7, %p88_p2  ;;  %p127_p11 = scmp.lt.s32.totalorder %s762_s14, 5 }
  0x10   : > { %s764_s23 = smov [#allocation3]   ;;  %p563_p0 = scmp.lt.s32.totalorder %s762_s14, 4 }
  0x11   : > { %s978_s21 = scalar_select %p847_p10, 1, 0 }
  0x12   : > { %p852_p12 = pnand %p513_p9, %p127_p11  ;;  %s143_s24 = sshll.u32 %s764_s23, 4  ;;  %s144_s24 = int_to_ptr.vmem [resolvable:$true] %s143_s24 }
  0x13   : > { %979 = sst [smem:[#allocation12_spill]] %s978_s21  ;;  %p867_p2 = pnand %p563_p0, %p832_p4 }
  0x14   : > { %p550_p13 = pneg %p852_p12  ;;  %s34_s27 = sadd.s32 1, %s758_s13 }
  0x15   : > { %s635_s28 = scalar_lea.vmem %s144_s24, 512  ;;  %p643_p10 = scmp.lt.s32.totalorder %s144_s24, %s144_s24 }
  0x16   : > { %p861_p1 = pnand %p550_p13, %p828_p3  ;;  %p636_p7 = scmp.ne.s32.totalorder %s144_s24, %s635_s28 }
  0x17   : > { %p644_p8 = scmp.lt.s32.totalorder %s635_s28, %s635_s28 }
  0x18   : > { %p626_p5 = pneg %p861_p1 }
  0x19   : > { %p645_p6 = por %p644_p8, %p643_p10 }
  0x1a   : > { %p638_p9 = pnand %p636_p7, %p626_p5 }
  0x1c   : > { %p639_p11 = pneg %p638_p9 }
  0x1e   : > { %p646_p13 = pnand %p645_p6, %p639_p11 }
  0x20   : > { %649 = shalt.err (!%p646_p13)
}
  0x21   : > { %s765_s29 = smov 128   ;;  %s766_s30 = smov 8  }
  0x22   : > { %553 = dma.hbm_to_vmem [thread:$0]  (!%p861_p1), %s968_s0, 512, %s144_s24, [#allocation4], %s765_s29, %s765_s29, %s766_s30  }
  0x23   : > { %p36_p4 = scmp.ge.s32.totalorder %s34_s27, 4  ;;  %s75_s5 = sadd.s32 1, %s750_s11 }
  0x24   : > { %s157_s6 = sand.u32 1, %s750_s11   ;;  %s532_s15 = sshll.u32 %s758_s13, 8 }
  0x25   : > { %s993_s27 = smov (%p36_p4, %s34_s27), 0  ;;  %s516_s7 = sshll.u32 %s157_s6, 6 }
  0x26   : > { %s71_s8 = ssub.s32 %s758_s13, %s993_s27  ;;  %s170_s23 = scalar_lea.hbm %s969_s1, %s532_s15 }
  0x27   : > { %p73_p6 = scmp.eq.s32.totalorder %s71_s8, 0  ;;  %s161_s25 = scalar_lea.vmem [#allocation6], %s516_s7 }
  0x28   : > { %s171_s28 = sshll.u32 %s161_s25, 4  ;;  %s158_s24 = scalar_lea.sflag [#allocation7], %s157_s6  ;;  %s172_s28 = int_to_ptr.vmem [resolvable:$true] %s171_s28 }
  0x29   : > { %s890_s21 = scalar_select %p73_p6, %s750_s11, %s75_s5  }
  0x2a   : > { %p652_p8 = pneg %p867_p2  ;;  %s663_s29 = scalar_lea.vmem %s172_s28, 1024 }
  0x2b   : > { %p664_p10 = scmp.ne.s32.totalorder %s172_s28, %s663_s29  ;;  %s767_s30 = smov [#allocation6]  }
  0x2c   : > { %s668_s3 = sshll.u32 %s767_s30, 4  ;;  %s669_s3 = int_to_ptr.vmem [resolvable:$false] %s668_s3 }
  0x2d   : > { %p666_p0 = pnand %p664_p10, %p652_p8  ;;  %s670_s4 = scalar_lea.vmem %s669_s3, 2048 }
  0x2e   : > { %p671_p5 = scmp.lt.s32.totalorder %s172_s28, %s669_s3  ;;  %p672_p7 = scmp.lt.s32.totalorder %s670_s4, %s663_s29 }
  0x2f   : > { %p667_p1 = pneg %p666_p0 }
  0x30   : > { %p673_p9 = por %p672_p7, %p671_p5 }
  0x32   : > { %p674_p11 = pnand %p673_p9, %p667_p1 }
  0x34   : > { %677 = shalt.err (!%p674_p11)
}
  0x35   : > { %s768_s7 = smov 1024   ;;  %s769_s5 = smov 256  }
  0x36   : > { %s770_s8 = smov 16   ;;  %183 = sbr.rel (%p852_p12) target bundleno = 288 (0x120), region = 28 }
  0x37   : > { %557 = dma.hbm_to_vmem [thread:$0]  (!%p867_p2), %s170_s23, 1024, %s172_s28, %s158_s24, %s768_s7, %s769_s5, %s770_s8  }
  0x3b   : > { %729 = dma.done.wait (%p828_p3), [#allocation4], 512  }
  0x3c   : > { %731 = vsyncadd (%p828_p3), [#allocation4], 4294966784  ;;  %s903_s6 = sand.u32 1, %s746_s10   ;;  %p983_p2 = scmp.ne.s32.totalorder %s976_s19, 0 }
  0x3d   : > { %s521_s15 = sshll.u32 %s903_s6, 6  ;;  %s190_s16 = scalar_lea.sflag [#allocation7], %s903_s6 }
  0x3e   : > { %s193_s26 = scalar_lea.vmem [#allocation6], %s521_s15 }
  0x3f   : > { %733 = dma.done.wait (%p983_p2), %s190_s16, 1024  }
  0x40   : > { %735 = vsyncadd (%p983_p2), %s190_s16, 4294966272  ;;  %v771_v0 = vmov 0.0   ;;  %v250_v1 = vld [vmem:[%s193_s26 + $0x38] sm:$0xff]  ;;  %v249_v2 = vld [vmem:[%s193_s26 + $0x30] sm:$0xff]  ;;  %vm251_vm0 = vcmask 261120   ;;  %s213_s17 = scalar_lea.vmem [#allocation8], %s521_s15 }
  0x41   : > { %328 = vmatprep.mubr.f32.mxu0 %v771_v0  ;;  %340 = vmatprep.mubr.f32.mxu1 %v771_v0  ;;  %v248_v3 = vld [vmem:[%s193_s26 + $0x28] sm:$0xff]  ;;  %v247_v4 = vld [vmem:[%s193_s26 + $0x20] sm:$0xff]  ;;  %v246_v5 = vld [vmem:[%s193_s26 + $0x18] sm:$0xff]  ;;  %s405_s19 = sshll.u32 %s213_s17, 4  ;;  %s533_s22 = sshll.u32 %s754_s12, 8  ;;  %s916_s19 = int_to_ptr.vmem [resolvable:$true] %s405_s19 }
  0x42   : > { %288 = vmatprep.subr.mxu0 %v250_v1  ;;  %534 = vmatprep.subr.mxu1 %v250_v1  ;;  %v245_v6 = vld [vmem:[%s193_s26 + $0x10] sm:$0xff]  ;;  %v244_v7 = vld [vmem:[%s193_s26 + $0x8] sm:$0xff]  ;;  %v243_v8 = vld [vmem:[%s193_s26] sm:$0xff]  ;;  %s921_s25 = scalar_lea.hbm %s970_s2, %s533_s22  ;;  %s389_s12 = scalar_lea.sflag [#allocation5], %s903_s6 }
  0x43   : > { %289 = vmatpush1.msra.mxu0 %v249_v2  ;;  %538 = vmatpush1.msra.mxu1 %v249_v2  ;;  %v239_v9 = vld [vmem:[#allocation3] sm:$0xff]  ;;  %v241_v10 = vld [vmem:[#allocation3 + $0x10] sm:$0xff]  ;;  %v240_v11 = vld [vmem:[#allocation3 + $0x8] sm:$0xff]  ;;  %s678_s28 = scalar_lea.vmem %s916_s19, 1024  ;;  %p984_p12 = scmp.ne.s32.totalorder %s977_s20, 0 }
  0x44   : > { %290 = vmatprep.subr.mxu0 %v248_v3  ;;  %535 = vmatprep.subr.mxu1 %v248_v3  ;;  %v242_v12 = vld [vmem:[#allocation3 + $0x18] sm:$0xff]  ;;  %p679_p3 = scmp.ne.s32.totalorder %s916_s19, %s678_s28  ;;  %s772_s24 = smov [#allocation8]  }
  0x45   : > { %291 = vmatpush1.msra.mxu0 %v247_v4  ;;  %539 = vmatpush1.msra.mxu1 %v247_v4  ;;  %s682_s29 = sshll.u32 %s772_s24, 4  ;;  %s683_s29 = int_to_ptr.vmem [resolvable:$false] %s682_s29 }
  0x46   : > { %292 = vmatprep.subr.mxu0 %v246_v5  ;;  %536 = vmatprep.subr.mxu1 %v246_v5  ;;  %p680_p13 = pnand %p679_p3, %p984_p12  ;;  %s684_s30 = scalar_lea.vmem %s683_s29, 2048 }
  0x47   : > { %293 = vmatpush1.msra.mxu0 %v245_v6  ;;  %540 = vmatpush1.msra.mxu1 %v245_v6  ;;  %p685_p6 = scmp.lt.s32.totalorder %s916_s19, %s683_s29  ;;  %p686_p8 = scmp.lt.s32.totalorder %s684_s30, %s678_s28 }
  0x48   : > { %294 = vmatprep.subr.mxu0 %v244_v7  ;;  %537 = vmatprep.subr.mxu1 %v244_v7  ;;  %p681_p4 = pneg %p680_p13 }
  0x49   : > { %295 = vmatpush1.msra.mxu0 %v243_v8  ;;  %541 = vmatpush1.msra.mxu1 %v243_v8  ;;  %p687_p10 = por %p686_p8, %p685_p6 }
  0x4a   : > { %523 = vmatmul.mubr.msk.f32.vlgmr.msra.gmra.mxu0 %vm251_vm0, %v239_v9  ;;  %525 = vmatmul.mubr.msk.f32.vlgmr.msra.gmra.mxu1 %vm251_vm0, %v241_v10 }
  0x4b   : > { %334 = vmatprep.mubr.f32.mxu0 %v771_v0  ;;  %346 = vmatprep.mubr.f32.mxu1 %v771_v0  ;;  %p688_p0 = pnand %p687_p10, %p681_p4 }
  0x4e   : > { %524 = vmatmul.mubr.msk.f32.gmra.mxu0 %vm251_vm0, %v240_v11  ;;  %526 = vmatmul.mubr.msk.f32.gmra.mxu1 %vm251_vm0, %v242_v12 }
 0x10a   : > { %v330_v13 = vpop.f32.mrf.mxu0  ;;  %v342_v14 = vpop.f32.mrf.mxu1 }
 0x10b   : > { %380 = vst [vmem:[%s213_s17] sm:$0xff] %v330_v13  ;;  %384 = vst [vmem:[%s213_s17 + $0x20] sm:$0xff] %v342_v14 }
 0x10c   : > { %v332_v15 = vpop.f32.mrf.mxu0  ;;  %v344_v16 = vpop.f32.mrf.mxu1 }
 0x10d   : > { %381 = vst [vmem:[%s213_s17 + $0x8] sm:$0xff] %v332_v15  ;;  %385 = vst [vmem:[%s213_s17 + $0x28] sm:$0xff] %v344_v16 }
 0x10e   : > { %v336_v17 = vpop.f32.mrf.mxu0  ;;  %v348_v18 = vpop.f32.mrf.mxu1 }
 0x10f   : > { %382 = vst [vmem:[%s213_s17 + $0x10] sm:$0xff] %v336_v17  ;;  %386 = vst [vmem:[%s213_s17 + $0x30] sm:$0xff] %v348_v18 }
 0x110   : > { %v338_v19 = vpop.f32.mrf.mxu0  ;;  %v350_v20 = vpop.f32.mrf.mxu1 }
 0x111   : > { %383 = vst [vmem:[%s213_s17 + $0x18] sm:$0xff] %v338_v19  ;;  %387 = vst [vmem:[%s213_s17 + $0x38] sm:$0xff] %v350_v20 }
 0x112   : > { %691 = shalt.err (!%p688_p0)
}
 0x113   : > { %s692_s3 = scalar_lea.hbm %s921_s25, 1024  ;;  %s696_s5 = scalar_lea.hbm %s970_s2, 4096 }
 0x114   : > { %p693_p1 = scmp.ne.s32.totalorder %s921_s25, %s692_s3  ;;  %p697_p9 = scmp.lt.s32.totalorder %s921_s25, %s970_s2 }
 0x115   : > { %p698_p11 = scmp.lt.s32.totalorder %s696_s5, %s692_s3 }
 0x116   : > { %p694_p5 = pnand %p693_p1, %p984_p12 }
 0x117   : > { %p699_p2 = por %p698_p11, %p697_p9 }
 0x118   : > { %p695_p7 = pneg %p694_p5 }
 0x11a   : > { %p700_p3 = pnand %p699_p2, %p695_p7 }
 0x11c   : > { %703 = shalt.err (!%p700_p3)
}
 0x11d   : > { %s773_s16 = smov 256   ;;  %s774_s26 = smov 1024  }
 0x11e   : > { %s775_s17 = smov 16  }
 0x11f   : > { %548 = dma.vmem_to_hbm [thread:$0]  (%p984_p12), %s916_s19, 1024, %s921_s25, %s389_s12, %s773_s16, %s774_s26, %s775_s17  }
 0x120 PF: > { %s985_s22 = sld [smem:[#allocation12_spill]]  ;;  %p565_p13 = scmp.ge.s32.totalorder %s762_s14, 2 }
 0x121   : > { %s420_s18 = sand.u32 1, %s742_s9  }
 0x122   : > { %s421_s23 = scalar_lea.sflag [#allocation5], %s420_s18 }
 0x126   : > { %p986_p4 = scmp.ne.s32.totalorder %s985_s22, 0 }
 0x128   : > { %p559_p6 = pnand %p565_p13, %p986_p4 }
 0x12a   : > { %p560_p8 = pneg %p559_p6 }
 0x12c   : > { %737 = dma.done.wait (%p560_p8), %s421_s23, 1024  }
 0x12d   : > { %739 = vsyncadd (%p560_p8), %s421_s23, 4294966272  ;;  %s19_s14 = sadd.s32 1, %s762_s14   ;;  %s987_s9 = smov %s746_s10 }
 0x12e   : > { %p16_p10 = scmp.ge.s32.totalorder %s19_s14, 6   ;;  %s988_s10 = smov %s750_s11 }
 0x12f   : > { %s989_s11 = smov %s890_s21  ;;  %s990_s12 = smov %s758_s13 }
 0x130   : > { %s991_s13 = smov %s993_s27  ;;  %18 = sbr.rel (!%p16_p10) target bundleno = 7 (0x7), region = 87 }
 0x135   :  { %426 = vsyncpa [#allocation4], 1 }
 0x136   :  { %428 = vsyncpa [#allocation4 + $0x1], 1 }
 0x137   :  { %429 = vsyncpa [#allocation7], 1 }
 0x138   :  { %431 = vsyncpa [#allocation7 + $0x1], 1 }
 0x139   :  { %432 = vsyncpa [#allocation5], 1 }
 0x13a   :  { %434 = vsyncpa [#allocation5 + $0x1], 1 }

</bundles_post_ra>
